<compile_context>
chip_gen: v7x
topology: tpu7x:2x2x1
jax: 0.10.0
libtpu: 0.0.40
codegen_flags: <defaults>
</compile_context>

<pallas_src>
import jax
import jax.numpy as jnp
from jax.experimental import pallas as pl
from jax.experimental.pallas import tpu as pltpu

# ---------------- config (small ViT-style shapes) ----------------
BATCH = 2
CHANNELS = 4
IMG_H = 16
IMG_W = 16
PATCH = 4
HIDDEN = 32
NUM_PATCHES = (IMG_H // PATCH) * (IMG_W // PATCH)   # 16
PATCH_DIM = CHANNELS * PATCH * PATCH                # 64
LANES = 128


def patch_embed_kernel(p_ref, w_ref, b_ref, o_ref):
    # p_ref: (tm, K)  bf16 -- g patches packed per lane-dense row
    # w_ref: (K, N)   bf16 -- block-diagonal projection weight
    # b_ref: (1, N)   f32
    # o_ref: (tm, N)  f32  -- full 128-lane output slab
    acc = jnp.dot(p_ref[...], w_ref[...], preferred_element_type=jnp.float32)
    o_ref[...] = (acc + b_ref[...]).astype(o_ref.dtype)


def patch_embeddings(x, weight, bias, *, patch_size, hidden_size):
    """x: (B, C, H, W); weight: (hidden, C, p, p); bias: (hidden,)."""
    B, C, H, W = x.shape
    p = patch_size
    Hp, Wp = H // p, W // p
    num_patches = Hp * Wp
    patch_dim = C * p * p

    # --- im2col (layout plumbing, outside the kernel):
    # (B, C, H, W) -> (B, num_patches, patch_dim), columns ordered (c, ph, pw)
    patches = x.reshape(B, C, Hp, p, Wp, p).transpose(0, 2, 4, 1, 3, 5)
    patches = patches.reshape(B, num_patches, patch_dim)

    # --- lane-dense packing: g consecutive patches per 128-lane output row ---
    if hidden_size <= LANES and LANES % hidden_size == 0 \
            and num_patches % (LANES // hidden_size) == 0:
        g = LANES // hidden_size                    # 4 for hidden=32
    else:
        g = 1                                       # fallback (masked stores)

    rows_per_b = num_patches // g                   # 4
    K = g * patch_dim                               # 256
    N = g * hidden_size                             # 128

    # collapse batch + packed-patch rows into one row axis
    total_rows = B * rows_per_b                     # 8
    patches_flat = patches.reshape(total_rows, K)

    # projection expanded to block-diagonal so packed rows map to packed outputs
    w2d = weight.reshape(hidden_size, patch_dim).T                  # (patch_dim, hidden)
    w_blk = jnp.kron(jnp.eye(g, dtype=w2d.dtype), w2d)              # (K, N)
    b_tiled = jnp.tile(bias, g).reshape(1, N)                       # (1, N)

    # row tiling: multiple of 8 sublanes, pad if necessary
    row_tile = max(8, min(256, (total_rows // 8) * 8 if total_rows >= 8 else 8))
    padded_rows = pl.cdiv(total_rows, row_tile) * row_tile
    if padded_rows != total_rows:
        patches_flat = jnp.pad(patches_flat,
                               ((0, padded_rows - total_rows), (0, 0)))

    out_packed = pl.pallas_call(
        patch_embed_kernel,
        out_shape=jax.ShapeDtypeStruct((padded_rows, N), jnp.float32),
        grid_spec=pltpu.PrefetchScalarGridSpec(
            num_scalar_prefetch=0,
            grid=(padded_rows // row_tile,),
            in_specs=[
                pl.BlockSpec((row_tile, K), lambda i: (i, 0)),
                # constant index maps: fetched once, resident in VMEM
                pl.BlockSpec((K, N), lambda i: (0, 0)),
                pl.BlockSpec((1, N), lambda i: (0, 0)),
            ],
            out_specs=pl.BlockSpec((row_tile, N), lambda i: (i, 0)),
        ),
        compiler_params=pltpu.CompilerParams(
            dimension_semantics=("parallel",)),
    )(patches_flat.astype(jnp.bfloat16),   # bf16 MXU operands, f32 accumulate
      w_blk.astype(jnp.bfloat16),
      b_tiled.astype(jnp.float32))

    # unpack outside the kernel: (total_rows, N) -> (B, num_patches, hidden)
    out = out_packed[:total_rows].reshape(B, num_patches, hidden_size)
    return out


def patch_embeddings_ref(x, weight, bias, *, patch_size):
    """Pure-JAX reference: nn.Conv2d(k=s=p) followed by flatten(2).transpose(1,2)."""
    p = patch_size
    hidden = weight.shape[0]
    y = jax.lax.conv_general_dilated(
        x, weight, window_strides=(p, p), padding="VALID",
        dimension_numbers=("NCHW", "OIHW", "NCHW"),
        precision=jax.lax.Precision.HIGHEST)
    y = y + bias.reshape(1, hidden, 1, 1)
    B, _, Hp, Wp = y.shape
    return y.reshape(B, hidden, Hp * Wp).transpose(0, 2, 1)


if __name__ == "__main__":
    key = jax.random.PRNGKey(0)
    kx, kw, kb = jax.random.split(key, 3)
    x = jax.random.normal(kx, (BATCH, CHANNELS, IMG_H, IMG_W), jnp.float32)
    weight = 0.02 * jax.random.normal(kw, (HIDDEN, CHANNELS, PATCH, PATCH), jnp.float32)
    bias = 0.02 * jax.random.normal(kb, (HIDDEN,), jnp.float32)

    out = patch_embeddings(x, weight, bias, patch_size=PATCH, hidden_size=HIDDEN)
    out = jax.block_until_ready(out)

    ref = patch_embeddings_ref(x, weight, bias, patch_size=PATCH)
    assert out.shape == (BATCH, NUM_PATCHES, HIDDEN)
    # bf16 matmul operands (f32 accumulation) -> slightly looser tolerance than pure f32
    assert jnp.allclose(out, ref, atol=2e-2, rtol=2e-2), "mismatch vs conv reference"

    print("KERNEL_OK")
</pallas_src>

<mosaic_0001>
module attributes {stable_mosaic.version = 11 : i64} {
  func.func @patch_embed_kernel(%arg0: i32, %arg1: memref<8x256xbf16, #tpu.memory_space<vmem>>, %arg2: memref<256x128xbf16, #tpu.memory_space<vmem>>, %arg3: memref<1x128xf32, #tpu.memory_space<vmem>>, %arg4: memref<8x128xf32, #tpu.memory_space<vmem>>) attributes {dimension_semantics = [#tpu.dimension_semantics<parallel>], iteration_bounds = array<i64: 1>, scalar_prefetch = 0 : i64, scratch_operands = 0 : i64, tpu.core_type = #tpu.core_type<tc>, window_params = [{transform_indices = @transform_0, window_bounds = array<i64: 8, 256>}, {pipeline_mode = #tpu.pipeline_mode<synchronous>, transform_indices = @transform_1, window_bounds = array<i64: 256, 128>}, {pipeline_mode = #tpu.pipeline_mode<synchronous>, transform_indices = @transform_2, window_bounds = array<i64: 1, 128>}, {transform_indices = @transform_3, window_bounds = array<i64: 8, 128>}]} {
    %c0 = arith.constant 0 : index
    %c0_0 = arith.constant 0 : index
    %0 = vector.load %arg1[%c0, %c0_0] : memref<8x256xbf16, #tpu.memory_space<vmem>>, vector<8x256xbf16>
    %c0_1 = arith.constant 0 : index
    %c0_2 = arith.constant 0 : index
    %1 = vector.load %arg2[%c0_1, %c0_2] : memref<256x128xbf16, #tpu.memory_space<vmem>>, vector<256x128xbf16>
    %cst = arith.constant dense<0.000000e+00> : vector<8x128xf32>
    %2 = tpu.matmul %0, %1, %cst {dimension_numbers = #tpu.dot_dimension_numbers<[1], [0], [0], [1], [0, 0, 1, 1], [], []>} : vector<8x256xbf16>, vector<256x128xbf16>, vector<8x128xf32> -> vector<8x128xf32>
    %c0_3 = arith.constant 0 : index
    %c0_4 = arith.constant 0 : index
    %3 = vector.load %arg3[%c0_3, %c0_4] : memref<1x128xf32, #tpu.memory_space<vmem>>, vector<1x128xf32>
    %4 = vector.broadcast %3 : vector<1x128xf32> to vector<8x128xf32>
    %5 = arith.addf %2, %4 : vector<8x128xf32>
    %c0_5 = arith.constant 0 : index
    %c0_6 = arith.constant 0 : index
    %6 = vector.load %arg4[%c0_5, %c0_6] : memref<8x128xf32, #tpu.memory_space<vmem>>, vector<8x128xf32>
    tpu.vector_store %arg4[%c0_5, %c0_6], %5 {strides = array<i32>} : memref<8x128xf32, #tpu.memory_space<vmem>>, vector<8x128xf32>,
    return
  }
  func.func @transform_0(%arg0: i32) -> (i32, i32) {
    %c0_i32 = arith.constant 0 : i32
    %c0_i32_0 = arith.constant 0 : i32
    return %arg0, %c0_i32 : i32, i32
  }
  func.func @transform_1(%arg0: i32) -> (i32, i32) {
    %c0_i32 = arith.constant 0 : i32
    %c0_i32_0 = arith.constant 0 : i32
    %c0_i32_1 = arith.constant 0 : i32
    return %c0_i32, %c0_i32_0 : i32, i32
  }
  func.func @transform_2(%arg0: i32) -> (i32, i32) {
    %c0_i32 = arith.constant 0 : i32
    %c0_i32_0 = arith.constant 0 : i32
    %c0_i32_1 = arith.constant 0 : i32
    return %c0_i32, %c0_i32_0 : i32, i32
  }
  func.func @transform_3(%arg0: i32) -> (i32, i32) {
    %c0_i32 = arith.constant 0 : i32
    %c0_i32_0 = arith.constant 0 : i32
    return %arg0, %c0_i32 : i32, i32
  }
}

</mosaic_0001>

<bundles_post_ra>
// kernel: tpu_custom_call.1
= control target key start
LH: loop header
LB: loop body
LE: loop exit
PB: predicated region body
PF: predicated region fallthrough
CT: control target
= control target key end

     0   :  { %8 = vsyncpa [#allocation3], 0  ;;  %s449_s0 = inlined_call_operand.hbm [shape: bf16[8,256], index: 0, kind: input, shape index: {}]   ;;  %s450_s1 = inlined_call_operand.hbm [shape: bf16[256,128], index: 1, kind: input, shape index: {}]   ;;  %s451_s2 = inlined_call_operand.vmem [shape: f32[1,128], index: 2, kind: input, shape index: {}]   ;;  %s452_s3 = inlined_call_operand.hbm [shape: f32[8,128], index: 3, kind: output, shape index: {}]  }
   0x1   :  { %9 = vsyncpa [#allocation6], 0 }
   0x2   :  { %10 = vsyncpa [#allocation4], 0  ;;  %s378_s12 = smov [#allocation2]   ;;  %s379_s14 = smov [#allocation5]  }
   0x3   :  { %s17_s13 = sshll.u32 %s378_s12, 4  ;;  %s26_s15 = sshll.u32 %s379_s14, 4  ;;  %s18_s13 = int_to_ptr.vmem [resolvable:$true] %s17_s13  ;;  %s403_s15 = int_to_ptr.vmem [resolvable:$true] %s26_s15 }
   0x4   :  { %s306_s18 = scalar_lea.hbm %s449_s0, 128 }
   0x5   :  { %p307_p0 = scmp.ne.s32.totalorder %s449_s0, %s306_s18  ;;  %p310_p1 = scmp.lt.u32.totalorder %s306_s18, %s449_s0 }
   0x7   :  { %p312_p2 = pnand %p310_p1, %p307_p0 }
   0x9   :  { %315 = shalt.err (!%p312_p2)
}
   0xa   :  { %s316_s23 = scalar_lea.vmem %s18_s13, 128  ;;  %p321_p4 = scmp.lt.s32.totalorder %s18_s13, %s18_s13 }
   0xb   :  { %p317_p3 = scmp.ne.s32.totalorder %s18_s13, %s316_s23  ;;  %p322_p5 = scmp.lt.s32.totalorder %s316_s23, %s316_s23 }
   0xd   :  { %p323_p6 = por %p322_p5, %p321_p4 }
   0xf   :  { %p324_p7 = pnand %p323_p6, %p317_p3 }
  0x11   :  { %327 = shalt.err (!%p324_p7)
}
  0x12   :  { %20 = dma.hbm_to_vmem [thread:$0]  %s449_s0, 128, %s18_s13, [#allocation3]  }
  0x13   :  { %s328_s28 = scalar_lea.hbm %s450_s1, 2048 }
  0x14   :  { %p329_p8 = scmp.ne.s32.totalorder %s450_s1, %s328_s28  ;;  %p332_p9 = scmp.lt.u32.totalorder %s328_s28, %s450_s1 }
  0x16   :  { %p334_p10 = pnand %p332_p9, %p329_p8 }
  0x18   :  { %337 = shalt.err (!%p334_p10)
}
  0x19   :  { %s338_s6 = scalar_lea.vmem %s403_s15, 2048  ;;  %p343_p12 = scmp.lt.s32.totalorder %s403_s15, %s403_s15 }
  0x1a   :  { %p339_p11 = scmp.ne.s32.totalorder %s403_s15, %s338_s6  ;;  %p344_p13 = scmp.lt.s32.totalorder %s338_s6, %s338_s6 }
  0x1c   :  { %p345_p0 = por %p344_p13, %p343_p12 }
  0x1e   :  { %p346_p1 = pnand %p345_p0, %p339_p11 }
  0x20   :  { %349 = shalt.err (!%p346_p1)
}
  0x21   :  { %s380_s0 = smov 64   ;;  %s381_s7 = smov 4  }
  0x22   :  { %32 = dma.hbm_to_vmem [thread:$0]  %s450_s1, 2048, %s403_s15, [#allocation6], %s380_s0, %s380_s0, %s381_s7  }
  0x23   :  { %372 = dma.done.wait [#allocation3], 128  }
  0x24   :  { %373 = vsyncadd [#allocation3], 4294967168 }
  0x25   :  { %374 = dma.done.wait [#allocation6], 2048  }
  0x26   :  { %375 = vsyncadd [#allocation6], 4294965248  ;;  %v288_v0 = vld [vmem:[#allocation5 + $0x40] sm:$0xff]   ;;  %v290_v2 = vld [vmem:[#allocation5 + $0x48] sm:$0xff]   ;;  %s382_s11 = smov [#allocation7]  }
  0x27   :  { %v289_v1 = vld [vmem:[#allocation5] sm:$0xff]   ;;  %261 = vmatprep.subr.bf16.mxu0 %v288_v0  ;;  %v291_v3 = vld [vmem:[#allocation5 + $0x8] sm:$0xff]   ;;  %v292_v4 = vld [vmem:[#allocation5 + $0x50] sm:$0xff]   ;;  %s232_s12 = sshll.u32 %s382_s11, 4  ;;  %s233_s12 = int_to_ptr.vmem [resolvable:$true] %s232_s12 }
  0x28   :  { %262 = vmatpush3.bf16.msra.mxu0 %v289_v1  ;;  %v293_v5 = vld [vmem:[#allocation5 + $0x10] sm:$0xff]   ;;  %v294_v6 = vld [vmem:[#allocation5 + $0x58] sm:$0xff]   ;;  %v296_v8 = vld [vmem:[#allocation5 + $0x60] sm:$0xff]   ;;  %s350_s13 = scalar_lea.vmem %s233_s12, 128  ;;  %p355_p3 = scmp.lt.s32.totalorder %s233_s12, %s233_s12 }
  0x29   :  { %263 = vmatprep.subr.bf16.mxu0 %v290_v2  ;;  %v295_v7 = vld [vmem:[#allocation5 + $0x18] sm:$0xff]   ;;  %v297_v9 = vld [vmem:[#allocation5 + $0x20] sm:$0xff]   ;;  %v298_v10 = vld [vmem:[#allocation5 + $0x68] sm:$0xff]   ;;  %p351_p2 = scmp.ne.s32.totalorder %s233_s12, %s350_s13  ;;  %p356_p4 = scmp.lt.s32.totalorder %s350_s13, %s350_s13 }
  0x2a   :  { %v42_v11 = vld [vmem:[#allocation2] sm:$0xff]  ;;  %v299_v13 = vld [vmem:[#allocation5 + $0x28] sm:$0xff]   ;;  %v300_v14 = vld [vmem:[#allocation5 + $0x70] sm:$0xff]  }
  0x2b   :  { %v244_v12 = vcombine.high %v42_v11, %v42_v11  ;;  %v301_v15 = vld [vmem:[#allocation5 + $0x30] sm:$0xff]   ;;  %v302_v16 = vld [vmem:[#allocation5 + $0x78] sm:$0xff]   ;;  %v243_v18 = vcombine.low %v42_v11, %v42_v11  ;;  %p357_p5 = por %p356_p4, %p355_p3 }
  0x2c   :  { %264 = vmatpush3.bf16.msra.mxu0 %v291_v3  ;;  %v303_v17 = vld [vmem:[#allocation5 + $0x38] sm:$0xff]  }
  0x2d   :  { %265 = vmatprep.subr.bf16.mxu0 %v292_v4  ;;  %217 = vmatprep.mubr.bf16.mxu0 %v244_v12  ;;  %v242_v20 = vld [vmem:[%s451_s2] ss:$0 sm:$0xff]  ;;  %p358_p6 = pnand %p357_p5, %p351_p2 }
  0x30   :  { %266 = vmatpush3.bf16.msra.mxu0 %v293_v5 }
  0x31   :  { %267 = vmatprep.subr.bf16.mxu0 %v294_v6 }
  0x34   :  { %268 = vmatpush3.bf16.msra.mxu0 %v295_v7 }
  0x35   :  { %269 = vmatprep.subr.bf16.mxu0 %v296_v8 }
  0x38   :  { %270 = vmatpush3.bf16.msra.mxu0 %v297_v9 }
  0x39   :  { %271 = vmatprep.subr.bf16.mxu0 %v298_v10 }
  0x3c   :  { %272 = vmatpush3.bf16.msra.mxu0 %v299_v13 }
  0x3d   :  { %273 = vmatprep.subr.bf16.mxu0 %v300_v14 }
  0x40   :  { %274 = vmatpush3.bf16.msra.mxu0 %v301_v15 }
  0x41   :  { %275 = vmatprep.subr.bf16.mxu0 %v302_v16 }
  0x44   :  { %276 = vmatpush3.bf16.msra.mxu0 %v303_v17 }
  0x47   :  { %218 = vmatmul.mubr.bf16.vlgmr.msra.gmra.mrb[0].mxu0 %v243_v18 }
 0x11a   :  { %v277_v19 = vpop.f32.mrb[0].mxu0 }
 0x11b   :  { %v278_v21 = vpop.f32.mrb[1].mxu0 }
 0x11c   :  { %v279_v22 = vadd.f32 %v278_v21, %v277_v19  ;;  %v280_v23 = vpop.f32.mrb[2].mxu0 }
 0x11d   :  { %v281_v24 = vpop.f32.mrb[3].mxu0 }
 0x11e   :  { %v220_v25 = vadd.f32 %v279_v22, %v242_v20 }
 0x120   :  { %225 = vst [vmem:[#allocation7] sm:$0xff] %v220_v25 }
 0x121   :  { %361 = shalt.err (!%p358_p6)
}
 0x122   :  { %s362_s2 = scalar_lea.hbm %s452_s3, 128 }
 0x123   :  { %p363_p7 = scmp.ne.s32.totalorder %s452_s3, %s362_s2  ;;  %p366_p8 = scmp.lt.u32.totalorder %s362_s2, %s452_s3 }
 0x125   :  { %p368_p9 = pnand %p366_p8, %p363_p7 }
 0x127   :  { %371 = shalt.err (!%p368_p9)
}
 0x128   :  { %235 = dma.vmem_to_hbm [thread:$0]  %s233_s12, 128, %s452_s3, [#allocation4]  }
 0x129   :  { %376 = dma.done.wait [#allocation4], 128  }
 0x12a   :  { %377 = vsyncadd [#allocation4], 4294967168 }
 0x12b   :  { %239 = vsyncpa [#allocation3], 1 }
 0x12c   :  { %240 = vsyncpa [#allocation6], 1 }
 0x12d   :  { %241 = vsyncpa [#allocation4], 1 }

</bundles_post_ra>
